<compile_context>
chip_gen: v7x
topology: tpu7x:2x2x1
jax: 0.10.0
libtpu: 0.0.40
codegen_flags: <defaults>
</compile_context>

<pallas_src>
import jax
import jax.numpy as jnp
from jax import lax
from jax.experimental import pallas as pl
from jax.experimental.pallas import tpu as pltpu

LANE = 128  # hidden widths are zero-padded to the 128-lane vreg width


def _round_up(n, m):
    return ((n + m - 1) // m) * m


# ----------------------------------------------------------------------------
# Kernel: one batch tile through the whole MLP.
#   x_ref   : [TB, S]     f32   (batch on sublanes, real state_size lanes)
#   w0_ref  : [S, H]      f32   [in, out] layout, out padded 32 -> 128
#   w1_ref  : [H, H]      f32   [in, out] layout, zero-padded
#   w2t_ref : [A8, H]     f32   torch [out, in] layout, out padded 4 -> 8
#   b01_ref : [2, H]      f32   row l = bias of hidden layer l (zero-padded)
#   b2_ref  : [A, 1]      f32   output bias as a column (broadcast along lanes)
#   o_ref   : [A, TB]     f32   transposed output: features on sublanes,
#                               batch on lanes  -> dense, lane-wide stores
# ----------------------------------------------------------------------------
def mlp_kernel(x_ref, w0_ref, w1_ref, w2t_ref, b01_ref, b2_ref, o_ref):
    x = x_ref[...]
    b01 = b01_ref[...]          # load packed hidden biases once, index in-register

    # fc0 + ReLU   (TB, S) @ (S, H) -> (TB, H)
    h = jnp.dot(x, w0_ref[...], preferred_element_type=jnp.float32)
    h = jnp.maximum(h + b01[0:1, :], 0.0)

    # fc1 + ReLU   (TB, H) @ (H, H) -> (TB, H)
    h = jnp.dot(h, w1_ref[...], preferred_element_type=jnp.float32)
    h = jnp.maximum(h + b01[1:2, :], 0.0)

    # fc2, emitted transposed:  y^T = W2_torch @ h^T  (A @ B^T form on the MXU)
    # -> (A8, TB), batch along lanes, so the final store is a tiny dense slab.
    y_t = lax.dot_general(
        w2t_ref[...], h,
        dimension_numbers=(((1,), (1,)), ((), ())),
        preferred_element_type=jnp.float32)

    a = o_ref.shape[0]                               # real action_size rows
    o_ref[...] = (y_t[0:a, :] + b2_ref[...]).astype(o_ref.dtype)


# ----------------------------------------------------------------------------
# Wrapper: batch-gridded pallas_call with VMEM-resident weights.
# ----------------------------------------------------------------------------
def network_forward(x, params, *, block_batch=2048):
    """x: [B, state_size] f32 -> [B, action_size] f32."""
    B, S = x.shape
    A = params["action_size"]
    w0, w1, w2t = params["w0"], params["w1"], params["w2t"]
    b01, b2 = params["b01"], params["b2"]

    # Batch tile = lane extent of the transposed output, so keep it a multiple
    # of 128.  Cap it so B large enough gets >= 4 grid steps (v7x megacore via
    # "parallel" semantics); big tiles amortize the ~0.35 us per-step overhead.
    tb_cap = _round_up(max(B // 4, 1), LANE)
    tb = max(LANE, min(_round_up(block_batch, LANE), tb_cap))
    b_pad = _round_up(B, tb)
    if b_pad != B:
        x = jnp.pad(x, ((0, b_pad - B), (0, 0)))

    out_t = pl.pallas_call(
        mlp_kernel,
        out_shape=jax.ShapeDtypeStruct((A, b_pad), jnp.float32),
        grid=(b_pad // tb,),
        in_specs=[
            pl.BlockSpec((tb, S), lambda i: (i, 0)),      # x: tiled over batch
            pl.BlockSpec(w0.shape, lambda i: (0, 0)),     # weights / biases stay
            pl.BlockSpec(w1.shape, lambda i: (0, 0)),     #   VMEM-resident
            pl.BlockSpec(w2t.shape, lambda i: (0, 0)),
            pl.BlockSpec(b01.shape, lambda i: (0, 0)),
            pl.BlockSpec(b2.shape, lambda i: (0, 0)),
        ],
        out_specs=pl.BlockSpec((A, tb), lambda i: (0, i)),
        compiler_params=pltpu.CompilerParams(
            dimension_semantics=("parallel",),            # megacore on v7x
            vmem_limit_bytes=32 * 1024 * 1024,            # headroom for v5e sweeps
        ),
    )(x, w0, w1, w2t, b01, b2)

    # (A, b_pad) -> (B, A): tiny transpose; no re-read of a padded 128-lane slab.
    return out_t[:, :B].T


# ----------------------------------------------------------------------------
# Parameter init mimicking torch.nn.Linear defaults (U(-k, k), k = 1/sqrt(fan_in)),
# stored in the padded layouts the kernel expects.  f32 throughout for exact
# parity with the f32 PyTorch module.
# ----------------------------------------------------------------------------
def init_params(key, state_size, layers, action_size, *, dtype=jnp.float32):
    assert len(layers) == 2, "kernel is specialized to layers=[h0, h1]"
    h0, h1 = layers

    def linear(k, fan_in, fan_out):
        kw, kb = jax.random.split(k)
        bound = 1.0 / float(fan_in) ** 0.5
        w = jax.random.uniform(kw, (fan_out, fan_in), dtype, -bound, bound)  # torch [out,in]
        b = jax.random.uniform(kb, (fan_out,), dtype, -bound, bound)
        return w, b

    k0, k1, k2 = jax.random.split(key, 3)
    w0, b0 = linear(k0, state_size, h0)        # (32, 8),  (32,)
    w1, b1 = linear(k1, h0, h1)                # (32, 32), (32,)
    w2, b2 = linear(k2, h1, action_size)       # (4, 32),  (4,)

    H = LANE
    A8 = _round_up(action_size, 8)

    w0_p = jnp.zeros((state_size, H), dtype).at[:, :h0].set(w0.T)      # [in, out]
    w1_p = jnp.zeros((H, H), dtype).at[:h0, :h1].set(w1.T)             # [in, out]
    w2t_p = jnp.zeros((A8, H), dtype).at[:action_size, :h1].set(w2)    # [out, in]
    b01_p = jnp.zeros((2, H), dtype).at[0, :h0].set(b0).at[1, :h1].set(b1)
    b2_p = jnp.zeros((action_size, 1), dtype).at[:, 0].set(b2)

    return {"w0": w0_p, "w1": w1_p, "w2t": w2t_p, "b01": b01_p, "b2": b2_p,
            "action_size": action_size}


# Pure-JAX reference with identical (padded, f32) parameters.
def network_forward_ref(x, params):
    A = params["action_size"]
    h = jnp.maximum(x @ params["w0"] + params["b01"][0], 0.0)
    h = jnp.maximum(h @ params["w1"] + params["b01"][1], 0.0)
    return h @ params["w2t"][:A].T + params["b2"][:, 0]


if __name__ == "__main__":
    state_size, action_size = 8, 4
    hidden_layers = [32, 32]

    key = jax.random.PRNGKey(0)
    key, kx = jax.random.split(key)
    params = init_params(key, state_size, hidden_layers, action_size)

    # Small smoke test (batch = 8, single grid step).
    x = jax.random.normal(kx, (8, state_size), jnp.float32)
    out = jax.block_until_ready(network_forward(x, params))
    ref = network_forward_ref(x, params)
    assert out.shape == (8, action_size)
    assert jnp.allclose(out, ref, atol=1e-3, rtol=1e-3), "mismatch vs reference (B=8)"

    # Multi-step grid + batch-padding path (B not a multiple of the tile).
    key, kx2 = jax.random.split(key)
    x2 = jax.random.normal(kx2, (1000, state_size), jnp.float32)
    out2 = jax.block_until_ready(network_forward(x2, params))
    ref2 = network_forward_ref(x2, params)
    assert out2.shape == (1000, action_size)
    assert jnp.allclose(out2, ref2, atol=1e-3, rtol=1e-3), "mismatch vs reference (B=1000)"

    print("KERNEL_OK")
</pallas_src>

<mosaic_0001>
module attributes {stable_mosaic.version = 11 : i64} {
  func.func @mlp_kernel(%arg0: i32, %arg1: memref<128x8xf32, #tpu.memory_space<vmem>>, %arg2: memref<8x128xf32, #tpu.memory_space<vmem>>, %arg3: memref<128x128xf32, #tpu.memory_space<vmem>>, %arg4: memref<8x128xf32, #tpu.memory_space<vmem>>, %arg5: memref<2x128xf32, #tpu.memory_space<vmem>>, %arg6: memref<4x1xf32, #tpu.memory_space<vmem>>, %arg7: memref<4x128xf32, #tpu.memory_space<vmem>>) attributes {dimension_semantics = [#tpu.dimension_semantics<parallel>], iteration_bounds = array<i64: 1>, scalar_prefetch = 0 : i64, scratch_operands = 0 : i64, tpu.core_type = #tpu.core_type<tc>, window_params = [{transform_indices = @transform_0, window_bounds = array<i64: 128, 8>}, {pipeline_mode = #tpu.pipeline_mode<synchronous>, transform_indices = @transform_1, window_bounds = array<i64: 8, 128>}, {pipeline_mode = #tpu.pipeline_mode<synchronous>, transform_indices = @transform_2, window_bounds = array<i64: 128, 128>}, {pipeline_mode = #tpu.pipeline_mode<synchronous>, transform_indices = @transform_3, window_bounds = array<i64: 8, 128>}, {pipeline_mode = #tpu.pipeline_mode<synchronous>, transform_indices = @transform_4, window_bounds = array<i64: 2, 128>}, {pipeline_mode = #tpu.pipeline_mode<synchronous>, transform_indices = @transform_5, window_bounds = array<i64: 4, 1>}, {transform_indices = @transform_6, window_bounds = array<i64: 4, 128>}]} {
    %c0 = arith.constant 0 : index
    %c0_0 = arith.constant 0 : index
    %0 = vector.load %arg1[%c0, %c0_0] : memref<128x8xf32, #tpu.memory_space<vmem>>, vector<128x8xf32>
    %c0_1 = arith.constant 0 : index
    %c0_2 = arith.constant 0 : index
    %1 = vector.load %arg5[%c0_1, %c0_2] : memref<2x128xf32, #tpu.memory_space<vmem>>, vector<2x128xf32>
    %c0_3 = arith.constant 0 : index
    %c0_4 = arith.constant 0 : index
    %2 = vector.load %arg2[%c0_3, %c0_4] : memref<8x128xf32, #tpu.memory_space<vmem>>, vector<8x128xf32>
    %cst = arith.constant dense<0.000000e+00> : vector<128x128xf32>
    %3 = tpu.matmul %0, %2, %cst {dimension_numbers = #tpu.dot_dimension_numbers<[1], [0], [0], [1], [0, 0, 1, 1], [], []>} : vector<128x8xf32>, vector<8x128xf32>, vector<128x128xf32> -> vector<128x128xf32>
    %4 = vector.extract_strided_slice %1 {offsets = [0, 0], sizes = [1, 128], strides = [1, 1]} : vector<2x128xf32> to vector<1x128xf32>
    %5 = vector.broadcast %4 : vector<1x128xf32> to vector<128x128xf32>
    %6 = arith.addf %3, %5 : vector<128x128xf32>
    %cst_5 = arith.constant 0.000000e+00 : f32
    %7 = vector.broadcast %cst_5 : f32 to vector<128x128xf32>
    %8 = arith.maximumf %6, %7 : vector<128x128xf32>
    %c0_6 = arith.constant 0 : index
    %c0_7 = arith.constant 0 : index
    %9 = vector.load %arg3[%c0_6, %c0_7] : memref<128x128xf32, #tpu.memory_space<vmem>>, vector<128x128xf32>
    %cst_8 = arith.constant dense<0.000000e+00> : vector<128x128xf32>
    %10 = tpu.matmul %8, %9, %cst_8 {dimension_numbers = #tpu.dot_dimension_numbers<[1], [0], [0], [1], [0, 0, 1, 1], [], []>} : vector<128x128xf32>, vector<128x128xf32>, vector<128x128xf32> -> vector<128x128xf32>
    %11 = vector.extract_strided_slice %1 {offsets = [1, 0], sizes = [1, 128], strides = [1, 1]} : vector<2x128xf32> to vector<1x128xf32>
    %12 = vector.broadcast %11 : vector<1x128xf32> to vector<128x128xf32>
    %13 = arith.addf %10, %12 : vector<128x128xf32>
    %cst_9 = arith.constant 0.000000e+00 : f32
    %14 = vector.broadcast %cst_9 : f32 to vector<128x128xf32>
    %15 = arith.maximumf %13, %14 : vector<128x128xf32>
    %c0_10 = arith.constant 0 : index
    %c0_11 = arith.constant 0 : index
    %16 = vector.load %arg4[%c0_10, %c0_11] : memref<8x128xf32, #tpu.memory_space<vmem>>, vector<8x128xf32>
    %cst_12 = arith.constant dense<0.000000e+00> : vector<8x128xf32>
    %17 = tpu.matmul %16, %15, %cst_12 {dimension_numbers = #tpu.dot_dimension_numbers<[1], [1], [0], [0], [0, 0, 1, 0], [], []>} : vector<8x128xf32>, vector<128x128xf32>, vector<8x128xf32> -> vector<8x128xf32>
    %18 = vector.extract_strided_slice %17 {offsets = [0, 0], sizes = [4, 128], strides = [1, 1]} : vector<8x128xf32> to vector<4x128xf32>
    %c0_13 = arith.constant 0 : index
    %c0_14 = arith.constant 0 : index
    %19 = vector.load %arg6[%c0_13, %c0_14] : memref<4x1xf32, #tpu.memory_space<vmem>>, vector<4x1xf32>
    %20 = vector.broadcast %19 : vector<4x1xf32> to vector<4x128xf32>
    %21 = arith.addf %18, %20 : vector<4x128xf32>
    %c0_15 = arith.constant 0 : index
    %c0_16 = arith.constant 0 : index
    %22 = vector.load %arg7[%c0_15, %c0_16] : memref<4x128xf32, #tpu.memory_space<vmem>>, vector<4x128xf32>
    tpu.vector_store %arg7[%c0_15, %c0_16], %21 {strides = array<i32>} : memref<4x128xf32, #tpu.memory_space<vmem>>, vector<4x128xf32>,
    return
  }
  func.func @transform_0(%arg0: i32) -> (i32, i32) {
    %c0_i32 = arith.constant 0 : i32
    %c0_i32_0 = arith.constant 0 : i32
    return %arg0, %c0_i32 : i32, i32
  }
  func.func @transform_1(%arg0: i32) -> (i32, i32) {
    %c0_i32 = arith.constant 0 : i32
    %c0_i32_0 = arith.constant 0 : i32
    %c0_i32_1 = arith.constant 0 : i32
    return %c0_i32, %c0_i32_0 : i32, i32
  }
  func.func @transform_2(%arg0: i32) -> (i32, i32) {
    %c0_i32 = arith.constant 0 : i32
    %c0_i32_0 = arith.constant 0 : i32
    %c0_i32_1 = arith.constant 0 : i32
    return %c0_i32, %c0_i32_0 : i32, i32
  }
  func.func @transform_3(%arg0: i32) -> (i32, i32) {
    %c0_i32 = arith.constant 0 : i32
    %c0_i32_0 = arith.constant 0 : i32
    %c0_i32_1 = arith.constant 0 : i32
    return %c0_i32, %c0_i32_0 : i32, i32
  }
  func.func @transform_4(%arg0: i32) -> (i32, i32) {
    %c0_i32 = arith.constant 0 : i32
    %c0_i32_0 = arith.constant 0 : i32
    %c0_i32_1 = arith.constant 0 : i32
    return %c0_i32, %c0_i32_0 : i32, i32
  }
  func.func @transform_5(%arg0: i32) -> (i32, i32) {
    %c0_i32 = arith.constant 0 : i32
    %c0_i32_0 = arith.constant 0 : i32
    %c0_i32_1 = arith.constant 0 : i32
    return %c0_i32, %c0_i32_0 : i32, i32
  }
  func.func @transform_6(%arg0: i32) -> (i32, i32) {
    %c0_i32 = arith.constant 0 : i32
    %c0_i32_0 = arith.constant 0 : i32
    return %c0_i32, %arg0 : i32, i32
  }
}

</mosaic_0001>

<bundles_post_ra>
// kernel: tpu_custom_call.1
= control target key start
LH: loop header
LB: loop body
LE: loop exit
PB: predicated region body
PF: predicated region fallthrough
CT: control target
= control target key end

     0   :  { %vm46_vm0 = vcmask 64512   ;;  %s1007_s0 = inlined_call_operand.vmem [shape: f32[128,8], index: 0, kind: input, shape index: {}]   ;;  %s1008_s1 = inlined_call_operand.vmem [shape: f32[8,128], index: 1, kind: input, shape index: {}]   ;;  %s1009_s2 = inlined_call_operand.vmem [shape: f32[128,128], index: 2, kind: input, shape index: {}]   ;;  %s1010_s3 = inlined_call_operand.vmem [shape: f32[8,128], index: 3, kind: input, shape index: {}]   ;;  %s1011_s4 = inlined_call_operand.vmem [shape: f32[2,128], index: 4, kind: input, shape index: {}]   ;;  %s1012_s5 = inlined_call_operand.vmem [shape: f32[4,1], index: 5, kind: input, shape index: {}]   ;;  %s1013_s6 = inlined_call_operand.hbm [shape: f32[4,128], index: 6, kind: output, shape index: {}]  }
   0x1   :  { %v41_v0 = vld [vmem:[%s1008_s1] sm:$0xff]  ;;  %v25_v2 = vld [vmem:[%s1007_s0 + $0x8] sm:$0xff]  ;;  %v26_v3 = vld [vmem:[%s1007_s0 + $0x10] sm:$0xff] }
   0x2   :  { %v24_v1 = vld [vmem:[%s1007_s0] sm:$0xff]  ;;  %612 = vmatprep.subr.mxu1 %v41_v0  ;;  %v27_v4 = vld [vmem:[%s1007_s0 + $0x18] sm:$0xff]  ;;  %v257_v7 = vld [vmem:[%s1009_s2 + $0x8] sm:$0xff] }
   0x3   :  { %614 = vmatprep.mubr.msk.f32.mxu1 %vm46_vm0, %v24_v1  ;;  %613 = vmatpush3.msra.mxu1 %v41_v0  ;;  %v28_v5 = vld [vmem:[%s1007_s0 + $0x20] sm:$0xff]  ;;  %v258_v8 = vld [vmem:[%s1009_s2 + $0x10] sm:$0xff]  ;;  %v259_v9 = vld [vmem:[%s1009_s2 + $0x18] sm:$0xff] }
   0x4   :  { %615 = vmatmul.mubr.msk.f32.vlgmr.msra.gmra.mrb[0].mxu1 %vm46_vm0, %v25_v2  ;;  %v256_v6 = vld [vmem:[%s1009_s2] sm:$0xff]  ;;  %v733_v11 = vpack.c.bf16 %v259_v9, %v258_v8  ;;  %v29_v12 = vld [vmem:[%s1007_s0 + $0x28] sm:$0xff]  ;;  %v30_v15 = vld [vmem:[%s1007_s0 + $0x30] sm:$0xff] }
   0x5   :  { %617 = vmatprep.mubr.msk.f32.mxu1 %vm46_vm0, %v26_v3  ;;  %v729_v10 = vpack.c.bf16 %v257_v7, %v256_v6  ;;  %v260_v13 = vld [vmem:[%s1009_s2 + $0x20] sm:$0xff]  ;;  %v261_v14 = vld [vmem:[%s1009_s2 + $0x28] sm:$0xff] }
   0x7   :  { %730 = vmatprep.subr.bf16.mxu1 %v729_v10 }
   0x8   :  { %618 = vmatmul.mubr.msk.f32.gmra.mrb[2].mxu1 %vm46_vm0, %v27_v4 }
   0x9   :  { %620 = vmatprep.mubr.msk.f32.mxu1 %vm46_vm0, %v28_v5  ;;  %732 = vmatpush3.bf16.msra.mxu1 %v729_v10 }
   0xa   :  { %11 = vsyncpa [#allocation3], 0  ;;  %734 = vmatprep.subr.bf16.mxu1 %v733_v11  ;;  %v737_v16 = vpack.c.bf16 %v261_v14, %v260_v13  ;;  %v31_v17 = vld [vmem:[%s1007_s0 + $0x38] sm:$0xff]  ;;  %v262_v18 = vld [vmem:[%s1009_s2 + $0x30] sm:$0xff]  ;;  %v42_v41 = vlaneseq  ;;  %vm816_vm1 = vmmov 0   ;;  %s819_s14 = smov [#allocation2]  }
   0xb   :  { %v263_v19 = vld [vmem:[%s1009_s2 + $0x38] sm:$0xff]  ;;  %v32_v20 = vld [vmem:[%s1007_s0 + $0x40] sm:$0xff]  ;;  %v33_v22 = vld [vmem:[%s1007_s0 + $0x48] sm:$0xff]  ;;  %s522_s15 = sshll.u32 %s819_s14, 4  ;;  %s523_s15 = int_to_ptr.vmem [resolvable:$true] %s522_s15 }
   0xc   :  { %621 = vmatmul.mubr.msk.f32.gmra.mrb[4].mxu1 %vm46_vm0, %v29_v12  ;;  %v741_v21 = vpack.c.bf16 %v263_v19, %v262_v18  ;;  %v264_v23 = vld [vmem:[%s1009_s2 + $0x40] sm:$0xff]  ;;  %v265_v24 = vld [vmem:[%s1009_s2 + $0x48] sm:$0xff]  ;;  %v34_v25 = vld [vmem:[%s1007_s0 + $0x50] sm:$0xff]  ;;  %v970_v42 = vshrl.u32 %v42_v41, 7  ;;  %s791_s16 = scalar_lea.vmem %s523_s15, 64  ;;  %p796_p1 = scmp.lt.s32.totalorder %s523_s15, %s523_s15 }
   0xd   :  { %623 = vmatprep.mubr.msk.f32.mxu1 %vm46_vm0, %v30_v15  ;;  %736 = vmatpush3.bf16.msra.mxu1 %v733_v11  ;;  %v745_v26 = vpack.c.bf16 %v265_v24, %v264_v23  ;;  %v35_v27 = vld [vmem:[%s1007_s0 + $0x58] sm:$0xff]  ;;  %v266_v28 = vld [vmem:[%s1009_s2 + $0x50] sm:$0xff]  ;;  %v36_v30 = vld [vmem:[%s1007_s0 + $0x60] sm:$0xff]  ;;  %p792_p0 = scmp.ne.s32.totalorder %s523_s15, %s791_s16  ;;  %p797_p2 = scmp.lt.s32.totalorder %s791_s16, %s791_s16 }
   0xe   :  { %738 = vmatprep.subr.bf16.mxu1 %v737_v16  ;;  %v267_v29 = vld [vmem:[%s1009_s2 + $0x58] sm:$0xff]  ;;  %v37_v32 = vld [vmem:[%s1007_s0 + $0x68] sm:$0xff]  ;;  %v268_v33 = vld [vmem:[%s1009_s2 + $0x60] sm:$0xff]  ;;  %v44_v43 = vsub.s32 0, %v970_v42 }
   0xf   :  { %v749_v31 = vpack.c.bf16 %v267_v29, %v266_v28  ;;  %v269_v34 = vld [vmem:[%s1009_s2 + $0x68] sm:$0xff]  ;;  %v38_v35 = vld [vmem:[%s1007_s0 + $0x70] sm:$0xff]  ;;  %v39_v37 = vld [vmem:[%s1007_s0 + $0x78] sm:$0xff]  ;;  %p798_p3 = por %p797_p2, %p796_p1 }
  0x10   :  { %624 = vmatmul.mubr.msk.f32.gmra.mrb[6].mxu1 %vm46_vm0, %v31_v17  ;;  %v753_v36 = vpack.c.bf16 %v269_v34, %v268_v33  ;;  %v270_v38 = vld [vmem:[%s1009_s2 + $0x70] sm:$0xff]  ;;  %v271_v39 = vld [vmem:[%s1009_s2 + $0x78] sm:$0xff]  ;;  %v976_v44 = vld [vmem:[%s1011_s4] sm:$0x3]  ;;  %v818_v33 = vmov 0   ;;  %v274_v34 = vsub.s32 1, %v970_v42 }
  0x11   :  { %626 = vmatprep.mubr.msk.f32.mxu1 %vm46_vm0, %v32_v20  ;;  %740 = vmatpush3.bf16.msra.mxu1 %v737_v16  ;;  %v757_v40 = vpack.c.bf16 %v271_v39, %v270_v38  ;;  %v45_v45 = vrot.slane %v976_v44, %v44_v43  ;;  %p799_p4 = pnand %p798_p3, %p792_p0 }
  0x12   :  { %742 = vmatprep.subr.bf16.mxu1 %v741_v21  ;;  %790 = vset.pattern.permute.xlu0 %v818_v33 }
  0x14   :  { %627 = vmatmul.mubr.msk.f32.gmra.mrb[8].mxu1 %vm46_vm0, %v33_v22 }
  0x15   :  { %629 = vmatprep.mubr.msk.f32.mxu1 %vm46_vm0, %v34_v25  ;;  %744 = vmatpush3.bf16.msra.mxu1 %v741_v21 }
  0x16   :  { %746 = vmatprep.subr.bf16.mxu1 %v745_v26 }
  0x18   :  { %630 = vmatmul.mubr.msk.f32.gmra.mrb[10].mxu1 %vm46_vm0, %v35_v27 }
  0x19   :  { %632 = vmatprep.mubr.msk.f32.mxu1 %vm46_vm0, %v36_v30  ;;  %748 = vmatpush3.bf16.msra.mxu1 %v745_v26  ;;  %v815_v30 = vmov 0.0|0.0  }
  0x1a   :  { %750 = vmatprep.subr.bf16.mxu1 %v749_v31  ;;  %761 = vmatprep.subr.bf16.mxu0 %v815_v30 }
  0x1c   :  { %633 = vmatmul.mubr.msk.f32.gmra.mrb[12].mxu1 %vm46_vm0, %v37_v32  ;;  %v508_v32 = vld [vmem:[%s1012_s5] sm:$0xf] }
  0x1d   :  { %635 = vmatprep.mubr.msk.f32.mxu1 %vm46_vm0, %v38_v35  ;;  %752 = vmatpush3.bf16.msra.mxu1 %v749_v31  ;;  %v817_v31 = vmov 0.0   ;;  %v275_v35 = vrot.slane %v976_v44, %v274_v34 }
  0x1e   :  { %754 = vmatprep.subr.bf16.mxu1 %v753_v36  ;;  %726 = vmatprep.mubr.msk.f32.mxu0 %vm816_vm1, %v817_v31 }
  0x1f   :  { %511 = vperm.xlu0 %790, %v508_v32  }
  0x20   :  { %636 = vmatmul.mubr.msk.f32.gmra.mrb[14].mxu1 %vm46_vm0, %v39_v37 }
  0x21   :  { %756 = vmatpush3.bf16.msra.mxu1 %v753_v36 }
  0x22   :  { %758 = vmatprep.subr.bf16.mxu1 %v757_v40 }
  0x25   :  { %760 = vmatpush3.bf16.msra.mxu1 %v757_v40 }
  0xd7   :  { %v616_v46 = vpop.f32.mrb[0].mxu1 }
  0xd8   :  { %v167_v47 = vadd.f32 %v616_v46, %v45_v45  ;;  %v161_v48 = vpop.f32.mrb[1].mxu1 }
  0xd9   :  { %v162_v49 = vadd.f32 %v161_v48, %v45_v45 }
  0xda   :  { %v241_v52 = vmax.f32 %v167_v47, 0.0 }
  0xdb   :  { %v240_v50 = vmax.f32 %v162_v49, 0.0  ;;  %v619_v51 = vpop.f32.mrb[2].mxu1 }
  0xdc   :  { %v177_v53 = vadd.f32 %v619_v51, %v45_v45  ;;  %v171_v54 = vpop.f32.mrb[3].mxu1 }
  0xdd   :  { %v172_v55 = vadd.f32 %v171_v54, %v45_v45  ;;  %670 = vmatprep.mubr.f32.mxu1 %v240_v50 }
  0xde   :  { %v243_v56 = vmax.f32 %v177_v53, 0.0  ;;  %671 = vmatmul.mubr.f32.vlgmr.msra.gmra.mrb[16].mxu1 %v241_v52 }
  0xdf   :  { %v242_v57 = vmax.f32 %v172_v55, 0.0  ;;  %v622_v58 = vpop.f32.mrb[4].mxu1 }
  0xe0   :  { %v187_v59 = vadd.f32 %v622_v58, %v45_v45  ;;  %v181_v60 = vpop.f32.mrb[5].mxu1 }
  0xe1   :  { %673 = vmatprep.mubr.f32.mxu1 %v242_v57  ;;  %v182_v61 = vadd.f32 %v181_v60, %v45_v45 }
  0xe2   :  { %674 = vmatmul.mubr.f32.gmra.mrb[18].mxu1 %v243_v56  ;;  %v245_v62 = vmax.f32 %v187_v59, 0.0 }
  0xe3   :  { %v244_v63 = vmax.f32 %v182_v61, 0.0  ;;  %v625_v0 = vpop.f32.mrb[6].mxu1 }
  0xe4   :  { %v197_v1 = vadd.f32 %v625_v0, %v45_v45  ;;  %v191_v2 = vpop.f32.mrb[7].mxu1 }
  0xe5   :  { %676 = vmatprep.mubr.f32.mxu1 %v244_v63  ;;  %v192_v3 = vadd.f32 %v191_v2, %v45_v45 }
  0xe6   :  { %677 = vmatmul.mubr.f32.gmra.mrb[20].mxu1 %v245_v62  ;;  %v247_v4 = vmax.f32 %v197_v1, 0.0 }
  0xe7   :  { %v246_v5 = vmax.f32 %v192_v3, 0.0  ;;  %v628_v6 = vpop.f32.mrb[8].mxu1 }
  0xe8   :  { %v207_v7 = vadd.f32 %v628_v6, %v45_v45  ;;  %v201_v8 = vpop.f32.mrb[9].mxu1 }
  0xe9   :  { %679 = vmatprep.mubr.f32.mxu1 %v246_v5  ;;  %v202_v9 = vadd.f32 %v201_v8, %v45_v45 }
  0xea   :  { %680 = vmatmul.mubr.f32.gmra.mrb[22].mxu1 %v247_v4  ;;  %v249_v10 = vmax.f32 %v207_v7, 0.0 }
  0xeb   :  { %v248_v11 = vmax.f32 %v202_v9, 0.0  ;;  %v631_v12 = vpop.f32.mrb[10].mxu1 }
  0xec   :  { %v217_v13 = vadd.f32 %v631_v12, %v45_v45  ;;  %v211_v14 = vpop.f32.mrb[11].mxu1 }
  0xed   :  { %682 = vmatprep.mubr.f32.mxu1 %v248_v11  ;;  %v212_v15 = vadd.f32 %v211_v14, %v45_v45 }
  0xee   :  { %683 = vmatmul.mubr.f32.gmra.mrb[24].mxu1 %v249_v10  ;;  %v251_v16 = vmax.f32 %v217_v13, 0.0 }
  0xef   :  { %v250_v17 = vmax.f32 %v212_v15, 0.0  ;;  %v634_v18 = vpop.f32.mrb[12].mxu1 }
  0xf0   :  { %v227_v19 = vadd.f32 %v634_v18, %v45_v45  ;;  %v221_v20 = vpop.f32.mrb[13].mxu1 }
  0xf1   :  { %685 = vmatprep.mubr.f32.mxu1 %v250_v17  ;;  %v222_v21 = vadd.f32 %v221_v20, %v45_v45 }
  0xf2   :  { %686 = vmatmul.mubr.f32.gmra.mrb[26].mxu1 %v251_v16  ;;  %v253_v22 = vmax.f32 %v227_v19, 0.0 }
  0xf3   :  { %v252_v23 = vmax.f32 %v222_v21, 0.0  ;;  %v637_v24 = vpop.f32.mrb[14].mxu1 }
  0xf4   :  { %v237_v25 = vadd.f32 %v637_v24, %v45_v45  ;;  %v231_v26 = vpop.f32.mrb[15].mxu1 }
  0xf5   :  { %688 = vmatprep.mubr.f32.mxu1 %v252_v23  ;;  %v232_v27 = vadd.f32 %v231_v26, %v45_v45 }
  0xf6   :  { %689 = vmatmul.mubr.f32.gmra.mrb[28].mxu1 %v253_v22  ;;  %v255_v28 = vmax.f32 %v237_v25, 0.0 }
  0xf7   :  { %v254_v29 = vmax.f32 %v232_v27, 0.0 }
  0xf9   :  { %691 = vmatprep.mubr.f32.mxu1 %v254_v29  ;;  %v512_v29 = vpop.permute.xlu0 %511 }
  0xfa   :  { %692 = vmatmul.mubr.f32.gmra.mrb[30].mxu1 %v255_v28  ;;  %v437_v28 = vld [vmem:[%s1010_s3] sm:$0xff] }
 0x1b1   :  { %v672_v36 = vpop.f32.mrb[16].mxu1 }
 0x1b2   :  { %v348_v37 = vadd.f32 %v672_v36, %v275_v35  ;;  %v342_v38 = vpop.f32.mrb[17].mxu1 }
 0x1b3   :  { %v343_v39 = vadd.f32 %v342_v38, %v275_v35 }
 0x1b4   :  { %v422_v40 = vmax.f32 %v348_v37, 0.0 }
 0x1b5   :  { %v421_v41 = vmax.f32 %v343_v39, 0.0  ;;  %v675_v43 = vpop.f32.mrb[18].mxu1 }
 0x1b6   :  { %v358_v45 = vadd.f32 %v675_v43, %v275_v35  ;;  %v352_v46 = vpop.f32.mrb[19].mxu1 }
 0x1b7   :  { %v353_v47 = vadd.f32 %v352_v46, %v275_v35  ;;  %v762_v48 = vpack.c.bf16 %v422_v40, %v421_v41 }
 0x1b8   :  { %v424_v49 = vmax.f32 %v358_v45, 0.0 }
 0x1b9   :  { %v423_v50 = vmax.f32 %v353_v47, 0.0  ;;  %763 = vmatpush3.bf16.xpose.msra.mxu0 %v762_v48  ;;  %v678_v51 = vpop.f32.mrb[20].mxu1 }
 0x1ba   :  { %v368_v52 = vadd.f32 %v678_v51, %v275_v35  ;;  %v362_v53 = vpop.f32.mrb[21].mxu1  ;;  %764 = vmatprep.subr.bf16.mxu0 %v815_v30 }
 0x1bb   :  { %v765_v42 = vpack.c.bf16 %v424_v49, %v423_v50  ;;  %v363_v44 = vadd.f32 %v362_v53, %v275_v35 }
 0x1bc   :  { %v426_v54 = vmax.f32 %v368_v52, 0.0 }
 0x1bd   :  { %v425_v55 = vmax.f32 %v363_v44, 0.0  ;;  %v681_v56 = vpop.f32.mrb[22].mxu1 }
 0x1be   :  { %v378_v57 = vadd.f32 %v681_v56, %v275_v35  ;;  %v372_v58 = vpop.f32.mrb[23].mxu1 }
 0x1bf   :  { %v768_v59 = vpack.c.bf16 %v426_v54, %v425_v55  ;;  %v373_v60 = vadd.f32 %v372_v58, %v275_v35 }
 0x1c0   :  { %v428_v61 = vmax.f32 %v378_v57, 0.0 }
 0x1c1   :  { %766 = vmatpush3.bf16.xpose.msra.mxu0 %v765_v42  ;;  %v427_v62 = vmax.f32 %v373_v60, 0.0  ;;  %v684_v63 = vpop.f32.mrb[24].mxu1 }
 0x1c2   :  { %767 = vmatprep.subr.bf16.mxu0 %v815_v30  ;;  %v388_v0 = vadd.f32 %v684_v63, %v275_v35  ;;  %v382_v1 = vpop.f32.mrb[25].mxu1 }
 0x1c3   :  { %v771_v2 = vpack.c.bf16 %v428_v61, %v427_v62  ;;  %v383_v3 = vadd.f32 %v382_v1, %v275_v35 }
 0x1c4   :  { %v430_v4 = vmax.f32 %v388_v0, 0.0 }
 0x1c5   :  { %v429_v5 = vmax.f32 %v383_v3, 0.0  ;;  %v687_v6 = vpop.f32.mrb[26].mxu1 }
 0x1c6   :  { %v398_v7 = vadd.f32 %v687_v6, %v275_v35  ;;  %v392_v8 = vpop.f32.mrb[27].mxu1 }
 0x1c7   :  { %v774_v9 = vpack.c.bf16 %v430_v4, %v429_v5  ;;  %v393_v10 = vadd.f32 %v392_v8, %v275_v35 }
 0x1c8   :  { %v432_v11 = vmax.f32 %v398_v7, 0.0 }
 0x1c9   :  { %769 = vmatpush3.bf16.xpose.msra.mxu0 %v768_v59  ;;  %v431_v12 = vmax.f32 %v393_v10, 0.0  ;;  %v690_v13 = vpop.f32.mrb[28].mxu1 }
 0x1ca   :  { %770 = vmatprep.subr.bf16.mxu0 %v815_v30  ;;  %v408_v14 = vadd.f32 %v690_v13, %v275_v35  ;;  %v402_v15 = vpop.f32.mrb[29].mxu1 }
 0x1cb   :  { %v777_v16 = vpack.c.bf16 %v432_v11, %v431_v12  ;;  %v403_v17 = vadd.f32 %v402_v15, %v275_v35 }
 0x1cc   :  { %v434_v18 = vmax.f32 %v408_v14, 0.0 }
 0x1cd   :  { %v433_v19 = vmax.f32 %v403_v17, 0.0  ;;  %v693_v20 = vpop.f32.mrb[30].mxu1 }
 0x1ce   :  { %v418_v21 = vadd.f32 %v693_v20, %v275_v35  ;;  %v412_v22 = vpop.f32.mrb[31].mxu1 }
 0x1cf   :  { %v780_v23 = vpack.c.bf16 %v434_v18, %v433_v19  ;;  %v413_v24 = vadd.f32 %v412_v22, %v275_v35 }
 0x1d0   :  { %v436_v25 = vmax.f32 %v418_v21, 0.0 }
 0x1d1   :  { %772 = vmatpush3.bf16.xpose.msra.mxu0 %v771_v2  ;;  %v435_v26 = vmax.f32 %v413_v24, 0.0 }
 0x1d2   :  { %773 = vmatprep.subr.bf16.mxu0 %v815_v30 }
 0x1d3   :  { %v783_v27 = vpack.c.bf16 %v436_v25, %v435_v26 }
 0x1d9   :  { %775 = vmatpush3.bf16.xpose.msra.mxu0 %v774_v9 }
 0x1da   :  { %776 = vmatprep.subr.bf16.mxu0 %v815_v30 }
 0x1e1   :  { %778 = vmatpush3.bf16.xpose.msra.mxu0 %v777_v16 }
 0x1e2   :  { %779 = vmatprep.subr.bf16.mxu0 %v815_v30 }
 0x1e9   :  { %781 = vmatpush3.bf16.xpose.msra.mxu0 %v780_v23 }
 0x1ea   :  { %782 = vmatprep.subr.bf16.mxu0 %v815_v30 }
 0x1f1   :  { %784 = vmatpush3.bf16.xpose.msra.mxu0 %v783_v27 }
 0x1f8   :  { %727 = vmatmul.mubr.f32.vlgmr.msra.gmra.mrb[0].mxu0 %v437_v28 }
 0x2cb   :  { %v504_v31 = vpop.f32.mrb[0].mxu0 }
 0x2cc   :  { %v514_v32 = vadd.f32 %v512_v29, %v504_v31  ;;  %v728_v33 = vpop.f32.mrb[1].mxu0 }
 0x2ce   :  { %515 = vst [vmem:[#allocation2] sm:$0xf] %v514_v32 }
 0x2cf   :  { %802 = shalt.err (!%p799_p4)
}
 0x2d0   :  { %s803_s3 = scalar_lea.hbm %s1013_s6, 64 }
 0x2d1   :  { %p804_p5 = scmp.ne.s32.totalorder %s1013_s6, %s803_s3  ;;  %p807_p6 = scmp.lt.u32.totalorder %s803_s3, %s1013_s6 }
 0x2d3   :  { %p809_p7 = pnand %p807_p6, %p804_p5 }
 0x2d5   :  { %812 = shalt.err (!%p809_p7)
}
 0x2d6   :  { %525 = dma.vmem_to_hbm [thread:$0]  %s523_s15, 64, %s1013_s6, [#allocation3]  }
 0x2d7   :  { %813 = dma.done.wait [#allocation3], 64  }
 0x2d8   :  { %814 = vsyncadd [#allocation3], 4294967232 }
 0x2d9   :  { %529 = vsyncpa [#allocation3], 1 }

</bundles_post_ra>
